<compile_context>
chip_gen: v7x
topology: tpu7x:2x2x1
jax: 0.10.0
libtpu: 0.0.40
codegen_flags: <defaults>
</compile_context>

<pallas_src>
import math
from functools import partial

import numpy as np
import jax
import jax.numpy as jnp
from jax import lax
from jax.experimental import pallas as pl
from jax.experimental.pallas import tpu as pltpu

TWO_PI = 2.0 * math.pi
TWO_PI_SQ = 2.0 * math.pi * math.pi


# ---------------------------------------------------------------------------
# ParameterSampler equivalent (glue: deterministic RNG draws in plain JAX)
# ---------------------------------------------------------------------------
class ParameterSampler:
    """Mirror of ml4gw ParameterSampler: dict of callables -> dict of (N,) arrays."""

    def __init__(self, **parameters):
        self.parameters = parameters

    def __call__(self, N, key):
        keys = jax.random.split(key, len(self.parameters))
        return {
            name: sampler(k, (N,))
            for (name, sampler), k in zip(self.parameters.items(), keys)
        }


# ---------------------------------------------------------------------------
# Pallas kernel: sine-Gaussian waveform evaluated on an (N, S) grid
# ---------------------------------------------------------------------------
def _sine_gaussian_kernel(params_ref, hplus_ref, hcross_ref, *,
                          num_samples, inv_sample_rate):
    # params_ref: (rt, 4) columns = [frequency, quality, hrss, phase]
    p = params_ref[...]
    f = p[:, 0:1]
    q = p[:, 1:2]
    a = p[:, 2:3]
    phi = p[:, 3:4]

    # Time grid generated in-kernel: no (1, S) input, DMA, or resident VMEM buffer.
    t = (lax.broadcasted_iota(jnp.int32, (1, num_samples), 1).astype(jnp.float32)
         - 0.5 * num_samples) * inv_sample_rate
    t2 = t * t                                    # hoisted: once per block

    # Per-row scalar math stays on (rt, 1) columns, off the per-element hot path.
    # tau = Q / (2*pi*f)  =>  1/(2*tau^2) = 2*pi^2 * (f/q)^2
    inv_q = pl.reciprocal(q, approx=True)
    inv_q = inv_q * (2.0 - q * inv_q)             # one Newton step -> ~f32 accuracy
    f_over_q = f * inv_q
    inv_two_tau2 = TWO_PI_SQ * (f_over_q * f_over_q)      # (rt, 1)

    # Per-element hot path (exp/cos/sin on EUP) kept in f32; only the store is narrowed
    # when out_dtype is 16-bit — a bf16 phase argument (up to ~1e2 rad) would cost ~1 rad
    # of phase error, which is far worse than the bf16 output rounding itself.
    env = a * jnp.exp(-(inv_two_tau2 * t2))               # (rt, S) via broadcast
    arg = (TWO_PI * f) * t + phi                          # (rt, S)
    hplus_ref[...] = (env * jnp.cos(arg)).astype(hplus_ref.dtype)
    hcross_ref[...] = (env * jnp.sin(arg)).astype(hcross_ref.dtype)
    # TODO(synk): v7x-only EUP saving (chunked angle-addition / Gaussian recurrence along S,
    # transcendentals only for the first 128-lane chunk) deferred; gain is ~1.5x at S=256.


def _round_up(x, m):
    return -(-x // m) * m


def _sublane_multiple(out_bytes):
    # f32 packs 1 row/sublane, bf16/f16 pack 2, int8/fp8 pack 4.
    return {4: 8, 2: 16, 1: 32}[out_bytes]


def _default_row_tile(N, S, out_bytes, sub_mult):
    # Cap the double-buffered output working set (2 outputs x 2 pipeline buffers x rt x S)
    # at ~16 MiB so the same tiling fits v7x (64 MiB physical / 32 MiB default scoped VMEM).
    budget = 16 << 20
    cap = (budget // (4 * S * out_bytes)) // sub_mult * sub_mult
    cap = max(sub_mult, min(4096, cap))
    # Prefer >= 2 grid steps so v7x's two TensorCores both get work (harmless on 1-TC chips).
    half = _round_up(-(-N // 2), sub_mult)
    return int(max(sub_mult, min(cap, half)))


@partial(jax.jit,
         static_argnames=("num_samples", "sample_rate", "row_tile", "out_dtype"))
def sine_gaussian_waveform(frequency, quality, hrss, phase, *,
                           num_samples=256, sample_rate=2048.0,
                           row_tile=None, out_dtype=jnp.float32):
    """Evaluate the sine-Gaussian waveform for N parameter sets.

    Args:
        frequency, quality, hrss, phase: (N,) float arrays.
    Returns:
        (hplus, hcross): each (N, num_samples) of dtype `out_dtype`
        (pass out_dtype=jnp.bfloat16 to halve HBM writeback on memory-bound chips).
    """
    N = frequency.shape[0]
    S = num_samples
    assert S % 128 == 0, "num_samples must be a multiple of 128 (lane width)"

    out_bytes = np.dtype(out_dtype).itemsize
    sub_mult = _sublane_multiple(out_bytes)
    rt = row_tile if row_tile is not None else _default_row_tile(N, S, out_bytes, sub_mult)
    assert rt % sub_mult == 0, (
        f"row_tile must be a multiple of {sub_mult} for {np.dtype(out_dtype).name} outputs")

    # Only the tiny parameter input is padded (so every block *read* is in-bounds with
    # harmless dummy rows); the outputs are emitted directly at (N, S) and Pallas masks
    # the writeback of the partial last block — no post-kernel slice copies.
    N_pad = _round_up(N, rt)
    params = jnp.stack([frequency, quality, hrss, phase], axis=1).astype(jnp.float32)
    if N_pad != N:
        params = jnp.concatenate(
            [params, jnp.ones((N_pad - N, 4), jnp.float32)], axis=0)

    grid = (N_pad // rt,)   # == cdiv(N, rt)

    # Scoped VMEM: double-buffered output tiles + params, with headroom, capped at 40 MiB
    # so it stays comfortably inside v7x's 64 MiB physical VMEM.
    vmem_need = 2 * 2 * rt * S * out_bytes + 2 * rt * 4 * 4
    vmem_limit = int(min(max(vmem_need + (8 << 20), 32 << 20), 40 << 20))

    out_block = pl.BlockSpec((rt, S), lambda i: (i, 0))

    hplus, hcross = pl.pallas_call(
        partial(_sine_gaussian_kernel,
                num_samples=S, inv_sample_rate=1.0 / sample_rate),
        out_shape=(
            jax.ShapeDtypeStruct((N, S), out_dtype),
            jax.ShapeDtypeStruct((N, S), out_dtype),
        ),
        grid_spec=pltpu.PrefetchScalarGridSpec(
            num_scalar_prefetch=0,
            grid=grid,
            in_specs=[
                pl.BlockSpec((rt, 4), lambda i: (i, 0)),   # stacked parameters (padded)
            ],
            out_specs=[out_block, out_block],
        ),
        compiler_params=pltpu.CompilerParams(
            dimension_semantics=("parallel",),
            vmem_limit_bytes=vmem_limit,
        ),
        cost_estimate=pl.CostEstimate(
            flops=8 * N * S,
            transcendentals=3 * N * S,
            bytes_accessed=2 * N * S * out_bytes + N_pad * 4 * 4,
        ),
    )(params)

    return hplus, hcross


# ---------------------------------------------------------------------------
# WaveformGenerator equivalent
# ---------------------------------------------------------------------------
class WaveformGenerator:
    def __init__(self, waveform, parameter_sampler):
        self.waveform = waveform
        self.parameter_sampler = parameter_sampler

    def __call__(self, N, key):
        parameters = self.parameter_sampler(N, key)
        return self.waveform(**parameters), parameters


# ---------------------------------------------------------------------------
# Pure-JAX reference for verification
# ---------------------------------------------------------------------------
def _reference(frequency, quality, hrss, phase, num_samples, sample_rate):
    t = (jnp.arange(num_samples, dtype=jnp.float32) - 0.5 * num_samples) / sample_rate
    f = frequency[:, None]
    q = quality[:, None]
    a = hrss[:, None]
    phi = phase[:, None]
    tau = q / (TWO_PI * f)
    env = a * jnp.exp(-(t[None, :] ** 2) / (2.0 * tau * tau))
    hp = env * jnp.cos(TWO_PI * f * t[None, :] + phi)
    hc = env * jnp.sin(TWO_PI * f * t[None, :] + phi)
    return hp, hc


if __name__ == "__main__":
    key = jax.random.PRNGKey(0)

    # deterministic "distributions" for the sampler (uniform ranges)
    def uniform(lo, hi):
        return lambda k, shape: jax.random.uniform(
            k, shape, dtype=jnp.float32, minval=lo, maxval=hi)

    sampler = ParameterSampler(
        frequency=uniform(32.0, 256.0),   # Hz
        quality=uniform(3.0, 20.0),       # dimensionless Q
        hrss=uniform(0.5, 2.0),           # amplitude
        phase=uniform(0.0, TWO_PI),       # radians
    )

    generator = WaveformGenerator(
        waveform=lambda frequency, quality, hrss, phase: sine_gaussian_waveform(
            frequency, quality, hrss, phase, num_samples=256, sample_rate=2048.0),
        parameter_sampler=sampler,
    )

    # --- small end-to-end generator run (module forward pass) ---
    N = 8
    (hplus, hcross), params = generator(N, key)
    jax.block_until_ready((hplus, hcross))

    ref_hp, ref_hc = _reference(params["frequency"], params["quality"],
                                params["hrss"], params["phase"], 256, 2048.0)
    assert hplus.shape == (N, 256) and hcross.shape == (N, 256)
    assert jnp.allclose(hplus, ref_hp, atol=1e-4, rtol=1e-4)
    assert jnp.allclose(hcross, ref_hc, atol=1e-4, rtol=1e-4)

    # --- extra check: N not a tile multiple, exercising the masked partial last block ---
    N2 = 200
    k2 = jax.random.split(key, 4)
    f2 = jax.random.uniform(k2[0], (N2,), jnp.float32, 32.0, 256.0)
    q2 = jax.random.uniform(k2[1], (N2,), jnp.float32, 3.0, 20.0)
    a2 = jax.random.uniform(k2[2], (N2,), jnp.float32, 0.5, 2.0)
    p2 = jax.random.uniform(k2[3], (N2,), jnp.float32, 0.0, TWO_PI)
    hp2, hc2 = sine_gaussian_waveform(f2, q2, a2, p2,
                                      num_samples=256, sample_rate=2048.0)
    jax.block_until_ready((hp2, hc2))
    ref_hp2, ref_hc2 = _reference(f2, q2, a2, p2, 256, 2048.0)
    assert hp2.shape == (N2, 256) and hc2.shape == (N2, 256)
    assert jnp.allclose(hp2, ref_hp2, atol=1e-4, rtol=1e-4)
    assert jnp.allclose(hc2, ref_hc2, atol=1e-4, rtol=1e-4)

    print("KERNEL_OK")
</pallas_src>

<mosaic_0001>
module attributes {stable_mosaic.version = 11 : i64} {
  func.func @_sine_gaussian_kernel(%arg0: i32, %arg1: memref<8x4xf32, #tpu.memory_space<vmem>>, %arg2: memref<8x256xf32, #tpu.memory_space<vmem>>, %arg3: memref<8x256xf32, #tpu.memory_space<vmem>>) attributes {dimension_semantics = [#tpu.dimension_semantics<parallel>], iteration_bounds = array<i64: 1>, scalar_prefetch = 0 : i64, scratch_operands = 0 : i64, tpu.core_type = #tpu.core_type<tc>, window_params = [{transform_indices = @transform_0, window_bounds = array<i64: 8, 4>}, {transform_indices = @transform_1, window_bounds = array<i64: 8, 256>}, {transform_indices = @transform_2, window_bounds = array<i64: 8, 256>}]} {
    %c0 = arith.constant 0 : index
    %c0_0 = arith.constant 0 : index
    %0 = vector.load %arg1[%c0, %c0_0] : memref<8x4xf32, #tpu.memory_space<vmem>>, vector<8x4xf32>
    %1 = vector.extract_strided_slice %0 {offsets = [0, 0], sizes = [8, 1], strides = [1, 1]} : vector<8x4xf32> to vector<8x1xf32>
    %2 = vector.extract_strided_slice %0 {offsets = [0, 1], sizes = [8, 1], strides = [1, 1]} : vector<8x4xf32> to vector<8x1xf32>
    %3 = vector.extract_strided_slice %0 {offsets = [0, 2], sizes = [8, 1], strides = [1, 1]} : vector<8x4xf32> to vector<8x1xf32>
    %4 = vector.extract_strided_slice %0 {offsets = [0, 3], sizes = [8, 1], strides = [1, 1]} : vector<8x4xf32> to vector<8x1xf32>
    %5 = tpu.iota {dimensions = array<i32: 1>} : vector<1x256xi32>
    %6 = arith.sitofp %5 : vector<1x256xi32> to vector<1x256xf32>
    %cst = arith.constant 1.280000e+02 : f32
    %7 = vector.broadcast %cst : f32 to vector<1x256xf32>
    %8 = arith.subf %6, %7 : vector<1x256xf32>
    %cst_1 = arith.constant 4.8828125E-4 : f32
    %9 = vector.broadcast %cst_1 : f32 to vector<1x256xf32>
    %10 = arith.mulf %8, %9 : vector<1x256xf32>
    %11 = arith.mulf %10, %10 : vector<1x256xf32>
    %12 = tpu.reciprocal %2 {approx = true} : vector<8x1xf32> -> vector<8x1xf32>
    %13 = arith.mulf %2, %12 : vector<8x1xf32>
    %cst_2 = arith.constant 2.000000e+00 : f32
    %14 = vector.broadcast %cst_2 : f32 to vector<8x1xf32>
    %15 = arith.subf %14, %13 : vector<8x1xf32>
    %16 = arith.mulf %12, %15 : vector<8x1xf32>
    %17 = arith.mulf %1, %16 : vector<8x1xf32>
    %18 = arith.mulf %17, %17 : vector<8x1xf32>
    %cst_3 = arith.constant 19.7392082 : f32
    %19 = vector.broadcast %cst_3 : f32 to vector<8x1xf32>
    %20 = arith.mulf %19, %18 : vector<8x1xf32>
    %21 = vector.broadcast %20 : vector<8x1xf32> to vector<8x256xf32>
    %22 = vector.broadcast %11 : vector<1x256xf32> to vector<8x256xf32>
    %23 = arith.mulf %21, %22 : vector<8x256xf32>
    %cst_4 = arith.constant 0.000000e+00 : f32
    %24 = vector.broadcast %cst_4 : f32 to vector<8x256xf32>
    %25 = arith.subf %24, %23 : vector<8x256xf32>
    %26 = math.exp %25 : vector<8x256xf32>
    %27 = vector.broadcast %3 : vector<8x1xf32> to vector<8x256xf32>
    %28 = arith.mulf %27, %26 : vector<8x256xf32>
    %cst_5 = arith.constant 6.28318548 : f32
    %29 = vector.broadcast %cst_5 : f32 to vector<8x1xf32>
    %30 = arith.mulf %29, %1 : vector<8x1xf32>
    %31 = vector.broadcast %30 : vector<8x1xf32> to vector<8x256xf32>
    %32 = vector.broadcast %10 : vector<1x256xf32> to vector<8x256xf32>
    %33 = arith.mulf %31, %32 : vector<8x256xf32>
    %34 = vector.broadcast %4 : vector<8x1xf32> to vector<8x256xf32>
    %35 = arith.addf %33, %34 : vector<8x256xf32>
    %36 = math.cos %35 : vector<8x256xf32>
    %37 = arith.mulf %28, %36 : vector<8x256xf32>
    %c0_6 = arith.constant 0 : index
    %c0_7 = arith.constant 0 : index
    %38 = vector.load %arg2[%c0_6, %c0_7] : memref<8x256xf32, #tpu.memory_space<vmem>>, vector<8x256xf32>
    tpu.vector_store %arg2[%c0_6, %c0_7], %37 {strides = array<i32>} : memref<8x256xf32, #tpu.memory_space<vmem>>, vector<8x256xf32>,
    %39 = math.sin %35 : vector<8x256xf32>
    %40 = arith.mulf %28, %39 : vector<8x256xf32>
    %c0_8 = arith.constant 0 : index
    %c0_9 = arith.constant 0 : index
    %41 = vector.load %arg3[%c0_8, %c0_9] : memref<8x256xf32, #tpu.memory_space<vmem>>, vector<8x256xf32>
    tpu.vector_store %arg3[%c0_8, %c0_9], %40 {strides = array<i32>} : memref<8x256xf32, #tpu.memory_space<vmem>>, vector<8x256xf32>,
    return
  }
  func.func @transform_0(%arg0: i32) -> (i32, i32) {
    %c0_i32 = arith.constant 0 : i32
    %c0_i32_0 = arith.constant 0 : i32
    return %arg0, %c0_i32 : i32, i32
  }
  func.func @transform_1(%arg0: i32) -> (i32, i32) {
    %c0_i32 = arith.constant 0 : i32
    %c0_i32_0 = arith.constant 0 : i32
    return %arg0, %c0_i32 : i32, i32
  }
  func.func @transform_2(%arg0: i32) -> (i32, i32) {
    %c0_i32 = arith.constant 0 : i32
    %c0_i32_0 = arith.constant 0 : i32
    return %arg0, %c0_i32 : i32, i32
  }
}

</mosaic_0001>

<bundles_post_ra>
// kernel: sine_gaussian_waveform.1
= control target key start
LH: loop header
LB: loop body
LE: loop exit
PB: predicated region body
PF: predicated region fallthrough
CT: control target
= control target key end

     0   :  { %8 = vsyncpa [#allocation3], 0  ;;  %s758_s0 = inlined_call_operand.vmem [shape: f32[8,4], index: 0, kind: input, shape index: {}]   ;;  %s759_s1 = inlined_call_operand.hbm [shape: f32[8,256], index: 1, kind: output, shape index: {0}]   ;;  %s760_s2 = inlined_call_operand.hbm [shape: f32[8,256], index: 2, kind: output, shape index: {1}]  }
   0x1   :  { %v12_v0 = vld [vmem:[%s758_s0] sm:$0xff] }
   0x2   :  { %9 = vsyncpa [#allocation5], 0  ;;  %v624_v1 = vmov 0   ;;  %v55_v2 = vmul.f32 6.2831855, %v12_v0  ;;  %v625_v3 = vmov 3   ;;  %562 = vrcp.f32 %v12_v0 }
   0x3   :  { %557 = vset.pattern.permute.xlu0 %v624_v1  ;;  %558 = vset.pattern.permute.xlu1 %v625_v3  ;;  %s626_s11 = smov 127   ;;  %v627_v8 = vmov 2   ;;  %v13_v9 = vlaneseq  ;;  %v628_v44 = vmov 683565275   ;;  %v629_v46 = vmov 2475754826  }
   0x4   :  { %64 = vperm.xlu1 %558, %v12_v0   ;;  %58 = vperm.xlu0 %557, %v55_v2   ;;  %v630_v51 = vmov 2131351028   ;;  %v631_v54 = vmov 2102212464   ;;  %v632_v57 = vmov 920167782  }
   0x5   :  { %v14_v10 = vand.u32 127, %v13_v9  ;;  %v633_v60 = vmov 1326507024   ;;  %s634_s0 = smov [#allocation2]   ;;  %s635_s13 = smov [#allocation4]  }
   0x6   :  { %s497_s12 = sshll.u32 %s634_s0, 4  ;;  %s507_s14 = sshll.u32 %s635_s13, 4  ;;  %s498_s12 = int_to_ptr.vmem [resolvable:$true] %s497_s12  ;;  %s508_s14 = int_to_ptr.vmem [resolvable:$true] %s507_s14 }
   0x7   :  { %v15_v11 = vadd.s32 128, %v14_v10  ;;  %v16_v12 = vcvt.s32.f32 %v14_v10  ;;  %s576_s15 = scalar_lea.vmem %s498_s12, 256  ;;  %p581_p1 = scmp.lt.s32.totalorder %s498_s12, %s498_s12 }
   0x8   :  { %559 = vset.pattern.permute.xlu1 %v624_v1  ;;  %560 = vset.pattern.permute.xlu0 %v627_v8  ;;  %p577_p0 = scmp.ne.s32.totalorder %s498_s12, %s576_s15  ;;  %p582_p2 = scmp.lt.s32.totalorder %s576_s15, %s576_s15 }
   0x9   :  { %v17_v13 = vcvt.s32.f32 %v15_v11  ;;  %v519_v14 = vadd.f32 -128.0, %v16_v12 }
   0xa   :  { %p583_p3 = por %p582_p2, %p581_p1 }
   0xb   :  { %v520_v15 = vadd.f32 -128.0, %v17_v13  ;;  %v654_v16 = vmul.f32 0.00048828125, %v519_v14 }
   0xc   :  { %v563_v4 = vpop.eup %562  ;;  %p584_p4 = pnand %p583_p3, %p577_p0 }
   0xd   :  { %v25_v5 = vmul.f32 %v563_v4, %v12_v0  ;;  %v656_v17 = vmul.f32 0.00048828125, %v520_v15 }
   0xf   :  { %v26_v6 = vsub.f32 2.0, %v25_v5 }
  0x11   :  { %v27_v7 = vmul.f32 %v563_v4, %v26_v6 }
  0x13   :  { %29 = vrot.lane.b32.xlu0 %v27_v7, %s626_s11 }
  0x17   :  { %50 = vperm.xlu0 %560, %v12_v0  }
  0x1b   :  { %561 = vset.pattern.permute.xlu0 %v625_v3 }
  0x83   :  { %v59_v18 = vpop.permute.xlu0 %58  ;;  %v65_v19 = vpop.permute.xlu1 %64 }
  0x84   :  { %v61_v20 = vmul.f32 %v59_v18, %v654_v16  ;;  %v62_v21 = vmul.f32 %v59_v18, %v656_v17 }
  0x86   :  { %v660_v22 = vadd.f32 %v65_v19, %v61_v20  ;;  %v662_v23 = vadd.f32 %v65_v19, %v62_v21 }
  0x87   :  { %v30_v24 = vpop.permute.xlu0 %29 }
  0x88   :  { %v72_v25 = vand.u32 2139095040, %v660_v22  ;;  %v69_v26 = vand.u32 2147483647, %v660_v22  ;;  %v175_v27 = vand.u32 2139095040, %v662_v23  ;;  %v32_v28 = vmul.f32 %v30_v24, %v12_v0 }
  0x89   :  { %vm71_vm13 = vcmp.lt.s32.totalorder %v660_v22, 0 }
  0x8a   :  { %v73_v29 = vshrl.u32 %v72_v25, 23  ;;  %v176_v30 = vshrl.u32 %v175_v27, 23  ;;  %v33_v31 = vmul.f32 %v32_v28, %v32_v28  ;;  %v76_v33 = vand.u32 8388607, %v69_v26 }
  0x8b   :  { %v172_v25 = vand.u32 2147483647, %v662_v23  ;;  %vm70_vm14 = vcmp.le.f32.partialorder %v69_v26, 0.7853982 }
  0x8c   :  { %v521_v32 = vadd.s32 4294967169, %v73_v29  ;;  %v525_v34 = vadd.s32 4294967169, %v176_v30  ;;  %v34_v35 = vmul.f32 19.739208, %v33_v31  ;;  %v77_v38 = vor.u32 8388608, %v76_v33 }
  0x8e   :  { %v79_v36 = vadd.s32 1, %v521_v32  ;;  %v182_v37 = vadd.s32 1, %v525_v34  ;;  %37 = vperm.xlu1 %559, %v34_v35   ;;  %v117_v48 = vshll.u32 %v77_v38, 8 }
  0x90   :  { %vm80_vm0 = vcmp.gt.s32.totalorder %v79_v36, 0  ;;  %vm183_vm1 = vcmp.gt.s32.totalorder %v182_v37, 0 }
  0x91   :  { %v81_v39 = vsel %vm80_vm0, %v79_v36, 0  ;;  %v184_v41 = vsel %vm183_vm1, %v182_v37, 0 }
  0x92   :  { %v83_v40 = vand.u32 31, %v81_v39  ;;  %v82_v42 = vshrl.u32 %v81_v39, 5  ;;  %v186_v49 = vand.u32 31, %v184_v41  ;;  %v185_v31 = vshrl.u32 %v184_v41, 5 }
  0x94   :  { %v84_v43 = vsub.s32 32, %v83_v40  ;;  %v86_v45 = vshll.u32 %v628_v44, %v83_v40  ;;  %v89_v47 = vshll.u32 %v629_v46, %v83_v40  ;;  %v92_v53 = vshll.u32 %v630_v51, %v83_v40 }
  0x95   :  { %v95_v56 = vshll.u32 %v631_v54, %v83_v40  ;;  %v98_v59 = vshll.u32 %v632_v57, %v83_v40  ;;  %vm101_vm2 = vcmp.lt.s32.totalorder %v82_v42, 1  ;;  %vm102_vm3 = vcmp.lt.s32.totalorder %v82_v42, 2 }
  0x96   :  { %v87_v50 = vshrl.u32 %v629_v46, %v84_v43  ;;  %v90_v52 = vshrl.u32 %v630_v51, %v84_v43  ;;  %v93_v55 = vshrl.u32 %v631_v54, %v84_v43  ;;  %v96_v58 = vshrl.u32 %v632_v57, %v84_v43 }
  0x97   :  { %v99_v61 = vshrl.u32 %v633_v60, %v84_v43  ;;  %vm104_vm4 = vcmp.lt.s32.totalorder %v82_v42, 4  ;;  %v85_v3 = vshrl.u32 %v628_v44, %v84_v43  ;;  %vm103_vm5 = vcmp.lt.s32.totalorder %v82_v42, 3 }
  0x98   :  { %v88_v62 = vor.u32 %v87_v50, %v86_v45  ;;  %v91_v63 = vor.u32 %v90_v52, %v89_v47  ;;  %v94_v0 = vor.u32 %v93_v55, %v92_v53  ;;  %v97_v1 = vor.u32 %v96_v58, %v95_v56 }
  0x99   :  { %v100_v2 = vor.u32 %v99_v61, %v98_v59  ;;  %v187_v9 = vsub.s32 32, %v186_v49  ;;  %v198_v28 = vshll.u32 %v631_v54, %v186_v49  ;;  %v201_v34 = vshll.u32 %v632_v57, %v186_v49 }
  0x9a   :  { %v106_v4 = vsel %vm104_vm4, %v94_v0, 2102212464  ;;  %v109_v5 = vsel %vm101_vm2, %v88_v62, %v91_v63  ;;  %v113_v6 = vsel %vm101_vm2, %v91_v63, %v94_v0  ;;  %v110_v7 = vsel %vm104_vm4, %v97_v1, 920167782 }
  0x9b   :  { %v114_v8 = vsel %vm104_vm4, %v100_v2, 1326507024  ;;  %v105_v10 = vsel %vm101_vm2, %v85_v3, %v88_v62  ;;  %v107_v11 = vsel %vm103_vm5, %v91_v63, %v106_v4  ;;  %v111_v12 = vsel %vm103_vm5, %v94_v0, %v110_v7 }
  0x9c   :  { %v115_v13 = vsel %vm103_vm5, %v97_v1, %v114_v8  ;;  %v112_v14 = vsel %vm102_vm3, %v109_v5, %v111_v12  ;;  %v108_v24 = vsel %vm102_vm3, %v105_v10, %v107_v11  ;;  %v190_v27 = vshrl.u32 %v629_v46, %v187_v9 }
  0x9d   :  { %v116_v15 = vsel %vm102_vm3, %v113_v6, %v115_v13  ;;  %v676_v20 = vmul.u32.u64.low %v117_v48, %v112_v14  ;;  %v677_v21 = vmul.u32.u64.high %v117_v48, %v112_v14, %v676_v20  ;;  %v199_v29 = vshrl.u32 %v632_v57, %v187_v9 }
  0x9e   :  { %v673_v18 = vmul.u32.u64.low %v117_v48, %v116_v15  ;;  %v674_v19 = vmul.u32.u64.high %v117_v48, %v116_v15, %v673_v18  ;;  %v202_v30 = vshrl.u32 %v633_v60, %v187_v9  ;;  %v193_v32 = vshrl.u32 %v630_v51, %v187_v9 }
  0x9f   :  { %v196_v33 = vshrl.u32 %v631_v54, %v187_v9  ;;  %v127_v35 = vadd.s32 1, %v677_v21  ;;  %v189_v36 = vshll.u32 %v628_v44, %v186_v49  ;;  %v200_v37 = vor.u32 %v199_v29, %v198_v28 }
  0xa0   :  { %vm126_vm6 = vc.u32 %v674_v19, %v676_v20  ;;  %v124_v38 = vmul.u32 %v117_v48, %v108_v24  ;;  %v192_v39 = vshll.u32 %v629_v46, %v186_v49  ;;  %v195_v40 = vshll.u32 %v630_v51, %v186_v49 }
  0xa1   :  { %v203_v42 = vor.u32 %v202_v30, %v201_v34  ;;  %v128_v43 = vsel %vm126_vm6, %v127_v35, %v677_v21  ;;  %v179_v45 = vand.u32 8388607, %v172_v25  ;;  %v191_v41 = vor.u32 %v190_v27, %v189_v36 }
  0xa2   :  { %v129_v47 = vadd.s32 %v128_v43, %v124_v38  ;;  %v194_v50 = vor.u32 %v193_v32, %v192_v39  ;;  %v197_v52 = vor.u32 %v196_v33, %v195_v40  ;;  %vm207_vm7 = vcmp.lt.s32.totalorder %v185_v31, 4 }
  0xa3   :  { %v213_v53 = vsel %vm207_vm7, %v200_v37, 920167782  ;;  %v217_v55 = vsel %vm207_vm7, %v203_v42, 1326507024  ;;  %vm204_vm8 = vcmp.lt.s32.totalorder %v185_v31, 1  ;;  %vm206_vm9 = vcmp.lt.s32.totalorder %v185_v31, 3 }
  0xa4   :  { %v130_v54 = vadd.s32 536870912, %v129_v47  ;;  %v180_v48 = vor.u32 8388608, %v179_v45  ;;  %v212_v49 = vsel %vm204_vm8, %v191_v41, %v194_v50  ;;  %v214_v51 = vsel %vm206_vm9, %v197_v52, %v213_v53 }
  0xa5   :  { %v216_v56 = vsel %vm204_vm8, %v194_v50, %v197_v52  ;;  %v218_v57 = vsel %vm206_vm9, %v200_v37, %v217_v55  ;;  %vm205_vm10 = vcmp.lt.s32.totalorder %v185_v31, 2  ;;  %v209_v6 = vsel %vm207_vm7, %v197_v52, 2102212464 }
  0xa6   :  { %v131_v46 = vshrl.u32 %v130_v54, 30  ;;  %v215_v59 = vsel %vm205_vm10, %v212_v49, %v214_v51  ;;  %v219_v61 = vsel %vm205_vm10, %v216_v56, %v218_v57  ;;  %v220_v62 = vshll.u32 %v180_v48, 8 }
  0xa7   :  { %v188_v7 = vshrl.u32 %v628_v44, %v187_v9  ;;  %v210_v11 = vsel %vm206_vm9, %v194_v50, %v209_v6  ;;  %v125_v14 = vadd.s32 %v676_v20, %v674_v19  ;;  %vm161_vm5 = vweird.f32 %v660_v22 }
  0xa8   :  { %v132_v58 = vshll.u32 %v131_v46, 30  ;;  %v695_v0 = vmul.u32.u64.low %v220_v62, %v215_v59  ;;  %v696_v1 = vmul.u32.u64.high %v220_v62, %v215_v59, %v695_v0  ;;  %v155_v38 = vsub.s32 4, %v131_v46 }
  0xa9   :  { %v699_v2 = vmul.u32.u64.low %v220_v62, %v219_v61  ;;  %v700_v3 = vmul.u32.u64.high %v220_v62, %v219_v61, %v699_v2  ;;  %v208_v10 = vsel %vm204_vm8, %v188_v7, %v191_v41  ;;  %vm174_vm7 = vcmp.lt.s32.totalorder %v662_v23, 0 }
  0xaa   :  { %v133_v60 = vsub.s32 %v129_v47, %v132_v58  ;;  %v230_v12 = vadd.s32 1, %v696_v1  ;;  %v211_v21 = vsel %vm205_vm10, %v208_v10, %v210_v11  ;;  %v156_v39 = vsel %vm71_vm13, %v155_v38, %v131_v46 }
  0xab   :  { %vm229_vm12 = vc.u32 %v700_v3, %v695_v0  ;;  %v227_v28 = vmul.u32 %v220_v62, %v211_v21  ;;  %v158_v43 = vsel %vm70_vm14, 0, %v156_v39  ;;  %vm173_vm8 = vcmp.le.f32.partialorder %v172_v25, 0.7853982  ;;  %v51_v39 = vpop.permute.xlu0 %50 }
  0xac   :  { %v135_v63 = vsub.s32 0, %v133_v60  ;;  %v231_v27 = vsel %vm229_vm12, %v230_v12, %v696_v1  ;;  %v372_v45 = vadd.s32 3, %v158_v43  ;;  %v162_v50 = vand.u32 3, %v158_v43 }
  0xad   :  { %v232_v32 = vadd.s32 %v231_v27, %v227_v28 }
  0xae   :  { %v522_v4 = vmin.u32 %v135_v63, %v133_v60  ;;  %v373_v47 = vand.u32 3, %v372_v45  ;;  %vm164_vm0 = vcmp.eq.s32.totalorder %v162_v50, 0  ;;  %vm167_vm1 = vcmp.eq.s32.totalorder %v162_v50, 2 }
  0xaf   :  { %v233_v36 = vadd.s32 536870912, %v232_v32  ;;  %vm163_vm4 = vcmp.lt.s32.totalorder %v162_v50, 2 }
  0xb0   :  { %v137_v5 = vclz %v522_v4  ;;  %vm378_vm15 = vcmp.eq.s32.totalorder %v373_v47, 2  ;;  %vm375_vm2 = vcmp.eq.s32.totalorder %v373_v47, 0  ;;  %vm374_vm3 = vcmp.lt.s32.totalorder %v373_v47, 2 }
  0xb1   :  { %v234_v20 = vshrl.u32 %v233_v36, 30 }
  0xb2   :  { %v523_v8 = vadd.s32 4294967294, %v137_v5  ;;  %v228_v5 = vadd.s32 %v695_v0, %v700_v3  ;;  %v22_v0 = vmul.f32 %v654_v16, %v654_v16  ;;  %v23_v3 = vmul.f32 %v656_v17, %v656_v17 }
  0xb3   :  { %v235_v42 = vshll.u32 %v234_v20, 30  ;;  %v258_v21 = vsub.s32 4, %v234_v20 }
  0xb4   :  { %vm524_vm11 = vcmp.lt.s32.totalorder %v523_v8, 0 }
  0xb5   :  { %v140_v13 = vsel %vm524_vm11, 0, %v523_v8  ;;  %v236_v41 = vsub.s32 %v232_v32, %v235_v42 }
  0xb6   :  { %v141_v15 = vsub.s32 32, %v140_v13  ;;  %v145_v18 = vsub.s32 4294967266, %v140_v13  ;;  %v142_v24 = vshll.u32 %v133_v60, %v140_v13 }
  0xb7   :  { %v238_v52 = vsub.s32 0, %v236_v41 }
  0xb8   :  { %v143_v44 = vshrl.u32 %v125_v14, %v141_v15  ;;  %v146_v9 = vadd.s32 127, %v145_v18 }
  0xb9   :  { %v526_v26 = vmin.u32 %v238_v52, %v236_v41 }
  0xba   :  { %v144_v29 = vor.u32 %v143_v44, %v142_v24  ;;  %v147_v30 = vshll.u32 %v146_v9, 23  ;;  %v259_v24 = vsel %vm174_vm7, %v258_v21, %v234_v20 }
  0xbb   :  { %v240_v61 = vclz %v526_v26  ;;  %v261_v28 = vsel %vm173_vm8, 0, %v259_v24 }
  0xbc   :  { %v148_v33 = vor.u32 4788187, %v147_v30  ;;  %v151_v35 = vcvt.s32.f32 %v144_v29  ;;  %v265_v16 = vand.u32 3, %v261_v28 }
  0xbd   :  { %v527_v62 = vadd.s32 4294967294, %v240_v61 }
  0xbe   :  { %v149_v34 = vand.u32 2147483647, %v148_v33  ;;  %v476_v33 = vadd.s32 3, %v261_v28  ;;  %vm267_vm11 = vcmp.eq.s32.totalorder %v265_v16, 0  ;;  %vm270_vm12 = vcmp.eq.s32.totalorder %v265_v16, 2 }
  0xbf   :  { %vm528_vm6 = vcmp.lt.s32.totalorder %v527_v62, 0 }
  0xc0   :  { %v152_v37 = vmul.f32 %v151_v35, %v149_v34  ;;  %v243_v63 = vsel %vm528_vm6, 0, %v527_v62  ;;  %v477_v36 = vand.u32 3, %v476_v33 }
  0xc1   :  { %v248_v1 = vsub.s32 4294967266, %v243_v63  ;;  %v244_v4 = vsub.s32 32, %v243_v63  ;;  %v245_v8 = vshll.u32 %v236_v41, %v243_v63 }
  0xc2   :  { %v153_v19 = vxor.u32 2147483648, %v152_v37  ;;  %vm479_vm9 = vcmp.eq.s32.totalorder %v477_v36, 0  ;;  %vm482_vm10 = vcmp.eq.s32.totalorder %v477_v36, 2 }
  0xc3   :  { %v249_v2 = vadd.s32 127, %v248_v1  ;;  %v246_v7 = vshrl.u32 %v228_v5, %v244_v4 }
  0xc4   :  { %v154_v31 = vsel %vm71_vm13, %v153_v19, %v152_v37  ;;  %vm478_vm13 = vcmp.lt.s32.totalorder %v477_v36, 2 }
  0xc5   :  { %v157_v40 = vsel %vm70_vm14, %v660_v22, %v154_v31  ;;  %v250_v6 = vshll.u32 %v249_v2, 23  ;;  %v247_v10 = vor.u32 %v246_v7, %v245_v8  ;;  %vm266_vm14 = vcmp.lt.s32.totalorder %v265_v16, 2 }
  0xc6   :  { %564 = vcosq.f32 %v157_v40 }
  0xc7   :  { %566 = vsinq.f32 %v157_v40  ;;  %v251_v22 = vor.u32 4788187, %v250_v6  ;;  %v254_v12 = vcvt.s32.f32 %v247_v10 }
  0xc9   :  { %v252_v11 = vand.u32 2147483647, %v251_v22 }
  0xcb   :  { %v255_v13 = vmul.f32 %v254_v12, %v252_v11 }
  0xcd   :  { %v256_v14 = vxor.u32 2147483648, %v255_v13 }
  0xcf   :  { %v257_v15 = vsel %vm174_vm7, %v256_v14, %v255_v13 }
  0xd0   :  { %v565_v53 = vpop.eup %564  ;;  %v260_v18 = vsel %vm173_vm8, %v662_v23, %v257_v15 }
  0xd1   :  { %v567_v54 = vpop.eup %566  ;;  %v168_v55 = vxor.u32 2147483648, %v565_v53  ;;  %568 = vcosq.f32 %v260_v18 }
  0xd2   :  { %v165_v48 = vxor.u32 2147483648, %v567_v54  ;;  %570 = vsinq.f32 %v260_v18 }
  0xd3   :  { %v380_v46 = vsel %vm378_vm15, %v168_v55, %v567_v54  ;;  %v169_v49 = vsel %vm167_vm1, %v168_v55, %v567_v54  ;;  %vm264_vm15 = vweird.f32 %v662_v23 }
  0xd4   :  { %v377_v51 = vsel %vm375_vm2, %v565_v53, %v165_v48  ;;  %v166_v56 = vsel %vm164_vm0, %v565_v53, %v165_v48 }
  0xd5   :  { %v381_v57 = vsel %vm374_vm3, %v377_v51, %v380_v46  ;;  %v170_v58 = vsel %vm163_vm4, %v166_v56, %v169_v49 }
  0xd6   :  { %v717_v59 = vsel %vm161_vm5, nan, %v381_v57  ;;  %v719_v60 = vsel %vm161_vm5, nan, %v170_v58 }
  0xdb   :  { %v569_v34 = vpop.eup %568 }
  0xdc   :  { %v571_v35 = vpop.eup %570  ;;  %v271_v38 = vxor.u32 2147483648, %v569_v34 }
  0xdd   :  { %v268_v37 = vxor.u32 2147483648, %v571_v35 }
  0xde   :  { %v484_v19 = vsel %vm482_vm10, %v271_v38, %v571_v35  ;;  %v272_v31 = vsel %vm270_vm12, %v271_v38, %v571_v35 }
  0xdf   :  { %v481_v17 = vsel %vm479_vm9, %v569_v34, %v268_v37  ;;  %v269_v20 = vsel %vm267_vm11, %v569_v34, %v268_v37 }
  0xe0   :  { %v485_v42 = vsel %vm478_vm13, %v481_v17, %v484_v19  ;;  %v273_v43 = vsel %vm266_vm14, %v269_v20, %v272_v31 }
  0xe1   :  { %v486_v50 = vsel %vm264_vm15, nan, %v485_v42  ;;  %v274_v53 = vsel %vm264_vm15, nan, %v273_v43 }
 0x10d   :  { %v38_v44 = vpop.permute.xlu1 %37 }
 0x10e   :  { %v40_v9 = vmul.f32 %v38_v44, %v22_v0  ;;  %v41_v27 = vmul.f32 %v38_v44, %v23_v3 }
 0x110   :  { %v42_v29 = vsub.f32 0.0, %v40_v9  ;;  %v43_v30 = vsub.f32 0.0, %v41_v27 }
 0x112   :  { %v44_v32 = vmul.f32 1.442695, %v42_v29  ;;  %v46_v25 = vmul.f32 1.442695, %v43_v30 }
 0x114   :  { %572 = vpow2.f32 %v44_v32 }
 0x115   :  { %574 = vpow2.f32 %v46_v25 }
 0x11e   :  { %v573_v40 = vpop.eup %572 }
 0x11f   :  { %v575_v45 = vpop.eup %574  ;;  %v53_v41 = vmul.f32 %v573_v40, %v51_v39 }
 0x120   :  { %v54_v47 = vmul.f32 %v575_v45, %v51_v39 }
 0x121   :  { %v487_v52 = vmul.f32 %v717_v59, %v53_v41  ;;  %v275_v54 = vmul.f32 %v719_v60, %v53_v41 }
 0x122   :  { %v488_v55 = vmul.f32 %v486_v50, %v54_v47  ;;  %v276_v48 = vmul.f32 %v274_v53, %v54_v47 }
 0x123   :  { %489 = vst [vmem:[#allocation4] sm:$0xff] %v487_v52  ;;  %277 = vst [vmem:[#allocation2] sm:$0xff] %v275_v54 }
 0x124   :  { %490 = vst [vmem:[#allocation4 + $0x8] sm:$0xff] %v488_v55  ;;  %278 = vst [vmem:[#allocation2 + $0x8] sm:$0xff] %v276_v48 }
 0x125   :  { %587 = shalt.err (!%p584_p4)
}
 0x126   :  { %s588_s18 = scalar_lea.hbm %s759_s1, 256 }
 0x127   :  { %p589_p5 = scmp.ne.s32.totalorder %s759_s1, %s588_s18  ;;  %p592_p6 = scmp.lt.u32.totalorder %s588_s18, %s759_s1 }
 0x129   :  { %p594_p7 = pnand %p592_p6, %p589_p5 }
 0x12b   :  { %597 = shalt.err (!%p594_p7)
}
 0x12c   :  { %500 = dma.vmem_to_hbm [thread:$0]  %s498_s12, 256, %s759_s1, [#allocation3]  }
 0x12d   :  { %s598_s25 = scalar_lea.vmem %s508_s14, 256  ;;  %p603_p9 = scmp.lt.s32.totalorder %s508_s14, %s508_s14 }
 0x12e   :  { %p599_p8 = scmp.ne.s32.totalorder %s508_s14, %s598_s25  ;;  %p604_p10 = scmp.lt.s32.totalorder %s598_s25, %s598_s25 }
 0x130   :  { %p605_p11 = por %p604_p10, %p603_p9 }
 0x132   :  { %p606_p12 = pnand %p605_p11, %p599_p8 }
 0x134   :  { %609 = shalt.err (!%p606_p12)
}
 0x135   :  { %s610_s28 = scalar_lea.hbm %s760_s2, 256 }
 0x136   :  { %p611_p13 = scmp.ne.s32.totalorder %s760_s2, %s610_s28  ;;  %p614_p0 = scmp.lt.u32.totalorder %s610_s28, %s760_s2 }
 0x138   :  { %p616_p1 = pnand %p614_p0, %p611_p13 }
 0x13a   :  { %619 = shalt.err (!%p616_p1)
}
 0x13b   :  { %510 = dma.vmem_to_hbm [thread:$0]  %s508_s14, 256, %s760_s2, [#allocation5]  }
 0x13c   :  { %620 = dma.done.wait [#allocation3], 256  }
 0x13d   :  { %621 = vsyncadd [#allocation3], 4294967040 }
 0x13e   :  { %622 = dma.done.wait [#allocation5], 256  }
 0x13f   :  { %623 = vsyncadd [#allocation5], 4294967040 }
 0x140   :  { %517 = vsyncpa [#allocation3], 1 }
 0x141   :  { %518 = vsyncpa [#allocation5], 1 }

</bundles_post_ra>
